<compile_context>
chip_gen: v7x
topology: tpu7x:2x2x1
jax: 0.10.0
libtpu: 0.0.40
codegen_flags: <defaults>
</compile_context>

<pallas_src>
import jax
import jax.numpy as jnp
from jax.experimental import pallas as pl
from jax.experimental.pallas import tpu as pltpu


TILE_B = 512  # batch rows per grid step; 2x double-buffered (TILE_B, n_in)/
              # (TILE_B, n_out) f32 tiles + all weights stay far under the
              # v7x 64 MiB VMEM budget at these layer widths.


def dueling_dqn_kernel(
    x_ref,                 # [TB, n_in]        f32
    w1_ref, b1_ref,        # [n_in, H]  bf16,  [1, H]     f32
    w2_ref, b2_ref,        # [H, 2H]    bf16,  [1, 2H]    f32
    wav_ref, bav_ref,      # [2H, 2H]   bf16 (adv | val fused), [1, 2H] f32
    wa2_ref, ba2_ref,      # [H, n_out] bf16,  [1, n_out] f32
    wv2_ref, bv2_ref,      # [1, H]     f32,   [1, 1]     f32
    out_ref,               # [TB, n_out]       f32
):
    n_hidden = wa2_ref.shape[0]

    x = x_ref[...].astype(jnp.bfloat16)

    # fc1 + ReLU
    h1 = jnp.dot(x, w1_ref[...], preferred_element_type=jnp.float32) + b1_ref[...]
    h1 = jnp.maximum(h1, 0.0).astype(jnp.bfloat16)

    # fc2 + ReLU
    h2 = jnp.dot(h1, w2_ref[...], preferred_element_type=jnp.float32) + b2_ref[...]
    h2 = jnp.maximum(h2, 0.0).astype(jnp.bfloat16)

    # fused fc1_adv | fc1_val: one [TB, 2H] @ [2H, 2H] matmul, split + ReLU.
    hav = jnp.dot(h2, wav_ref[...], preferred_element_type=jnp.float32) + bav_ref[...]
    hav = jnp.maximum(hav, 0.0)
    h_adv = hav[:, :n_hidden].astype(jnp.bfloat16)
    h_val = hav[:, n_hidden:]                         # stays f32 for the VPU path

    # advantage head (MXU)
    adv = jnp.dot(h_adv, wa2_ref[...], preferred_element_type=jnp.float32) + ba2_ref[...]

    # value head: VPU multiply + lane reduce (free alongside MXU work; an
    # N=1 matmul would light up 1/256th of the MXU).
    val = jnp.sum(h_val * wv2_ref[...], axis=-1, keepdims=True) + bv2_ref[...]

    # dueling combine: Q = V + A - mean_a(A)
    adv_mean = jnp.mean(adv, axis=-1, keepdims=True)
    # NOTE: n_out (=8) < 128 lanes forces a masked vst on the writeback; lane-
    # padding the output to 128 would unmask it but 16x the output HBM bytes,
    # a net loss at this tiny n_out, so we keep the natural [TB, n_out] slab.
    out_ref[...] = val + adv - adv_mean


def prepare_params(params):
    """One-time layout pass (do NOT call per forward): transpose weights to
    [in, out], fuse adv|val layer-1 weights/biases, cast matmul weights to
    bf16, reshape biases to [1, out] rows."""
    f32 = jnp.float32
    return {
        "w1": params["fc1_w"].T.astype(jnp.bfloat16),
        "b1": params["fc1_b"].reshape(1, -1).astype(f32),
        "w2": params["fc2_w"].T.astype(jnp.bfloat16),
        "b2": params["fc2_b"].reshape(1, -1).astype(f32),
        "w_av": jnp.concatenate(
            [params["fc1_adv_w"].T, params["fc1_val_w"].T], axis=1
        ).astype(jnp.bfloat16),                                    # [2H, 2H]
        "b_av": jnp.concatenate(
            [params["fc1_adv_b"], params["fc1_val_b"]]
        ).reshape(1, -1).astype(f32),                              # [1, 2H]
        "w_adv2": params["fc2_adv_w"].T.astype(jnp.bfloat16),      # [H, n_out]
        "b_adv2": params["fc2_adv_b"].reshape(1, -1).astype(f32),  # [1, n_out]
        "w_val2": params["fc2_val_w"].reshape(1, -1).astype(f32),  # [1, H]
        "b_val2": params["fc2_val_b"].reshape(1, 1).astype(f32),   # [1, 1]
    }


@jax.jit
def dueling_dqn_forward(x, prepared):
    """x: [B, n_in] float32.  prepared: output of prepare_params()."""
    B, n_in = x.shape
    n_out = prepared["w_adv2"].shape[1]

    # Batch tiling: largest tile <= TILE_B; pad B up to a tile multiple so
    # every grid step sees a full block (padded rows sliced off at the end).
    tb = min(TILE_B, B)
    b_pad = pl.cdiv(B, tb) * tb
    if b_pad != B:
        x = jnp.pad(x, ((0, b_pad - B), (0, 0)))
    grid = (b_pad // tb,)

    def resident(i):                    # weights/biases: same block each step
        return (0, 0)

    w_keys = ("w1", "b1", "w2", "b2", "w_av", "b_av",
              "w_adv2", "b_adv2", "w_val2", "b_val2")
    w_specs = [pl.BlockSpec(prepared[k].shape, resident) for k in w_keys]

    out = pl.pallas_call(
        dueling_dqn_kernel,
        out_shape=jax.ShapeDtypeStruct((b_pad, n_out), jnp.float32),
        grid=grid,
        in_specs=[pl.BlockSpec((tb, n_in), lambda i: (i, 0))] + w_specs,
        out_specs=pl.BlockSpec((tb, n_out), lambda i: (i, 0)),
        compiler_params=pltpu.CompilerParams(
            dimension_semantics=("parallel",),   # megacore shard on v7x
        ),
    )(
        x,
        prepared["w1"], prepared["b1"],
        prepared["w2"], prepared["b2"],
        prepared["w_av"], prepared["b_av"],
        prepared["w_adv2"], prepared["b_adv2"],
        prepared["w_val2"], prepared["b_val2"],
    )
    return out[:B] if b_pad != B else out


def init_params(key, n_in, n_hidden, n_out):
    """Deterministic PyTorch-Linear-style init: U(-1/sqrt(fan_in), 1/sqrt(fan_in))."""
    layers = {
        "fc1": (n_hidden, n_in),
        "fc2": (2 * n_hidden, n_hidden),
        "fc1_adv": (n_hidden, 2 * n_hidden),
        "fc1_val": (n_hidden, 2 * n_hidden),
        "fc2_adv": (n_out, n_hidden),
        "fc2_val": (1, n_hidden),
    }
    params = {}
    for name, (fan_out, fan_in) in layers.items():
        key, kw, kb = jax.random.split(key, 3)
        bound = 1.0 / (fan_in ** 0.5)
        params[name + "_w"] = jax.random.uniform(
            kw, (fan_out, fan_in), jnp.float32, -bound, bound)
        params[name + "_b"] = jax.random.uniform(
            kb, (fan_out,), jnp.float32, -bound, bound)
    return params


def reference_forward(x, params):
    """Pure-JAX f32 reference replicating the PyTorch forward semantics."""
    def lin(h, name):
        return h @ params[name + "_w"].T + params[name + "_b"]

    h = jax.nn.relu(lin(x, "fc1"))
    h = jax.nn.relu(lin(h, "fc2"))
    adv = jax.nn.relu(lin(h, "fc1_adv"))
    val = jax.nn.relu(lin(h, "fc1_val"))
    adv = lin(adv, "fc2_adv")
    val = lin(val, "fc2_val")  # [B, 1]
    return val + adv - jnp.mean(adv, axis=1, keepdims=True)


if __name__ == "__main__":
    key = jax.random.PRNGKey(0)
    kx, kp = jax.random.split(key)

    B, n_in, n_hidden, n_out = 2, 16, 32, 8
    x = jax.random.normal(kx, (B, n_in), jnp.float32)
    params = init_params(kp, n_in, n_hidden, n_out)
    prepared = prepare_params(params)          # one-time layout/cast pass

    out = dueling_dqn_forward(x, prepared)
    out = jax.block_until_ready(out)

    ref = reference_forward(x, params)
    assert out.shape == (B, n_out)
    # bf16 matmul operands (f32 accumulation) -> loosened tolerance vs. the
    # pure-f32 reference, as noted in the perf review.
    max_err = jnp.max(jnp.abs(out - ref))
    assert jnp.allclose(out, ref, atol=5e-2, rtol=5e-2), (
        f"mismatch vs reference: max abs diff {max_err:.3e}")

    print("KERNEL_OK")
</pallas_src>

<mosaic_0001>
module attributes {stable_mosaic.version = 11 : i64} {
  func.func @dueling_dqn_kernel(%arg0: i32, %arg1: memref<2x16xf32, #tpu.memory_space<vmem>>, %arg2: memref<16x32xbf16, #tpu.memory_space<vmem>>, %arg3: memref<1x32xf32, #tpu.memory_space<vmem>>, %arg4: memref<32x64xbf16, #tpu.memory_space<vmem>>, %arg5: memref<1x64xf32, #tpu.memory_space<vmem>>, %arg6: memref<64x64xbf16, #tpu.memory_space<vmem>>, %arg7: memref<1x64xf32, #tpu.memory_space<vmem>>, %arg8: memref<32x8xbf16, #tpu.memory_space<vmem>>, %arg9: memref<1x8xf32, #tpu.memory_space<vmem>>, %arg10: memref<1x32xf32, #tpu.memory_space<vmem>>, %arg11: memref<1x1xf32, #tpu.memory_space<vmem>>, %arg12: memref<2x8xf32, #tpu.memory_space<vmem>>) attributes {dimension_semantics = [#tpu.dimension_semantics<parallel>], iteration_bounds = array<i64: 1>, scalar_prefetch = 0 : i64, scratch_operands = 0 : i64, tpu.core_type = #tpu.core_type<tc>, window_params = [{transform_indices = @transform_0, window_bounds = array<i64: 2, 16>}, {pipeline_mode = #tpu.pipeline_mode<synchronous>, transform_indices = @transform_1, window_bounds = array<i64: 16, 32>}, {pipeline_mode = #tpu.pipeline_mode<synchronous>, transform_indices = @transform_2, window_bounds = array<i64: 1, 32>}, {pipeline_mode = #tpu.pipeline_mode<synchronous>, transform_indices = @transform_3, window_bounds = array<i64: 32, 64>}, {pipeline_mode = #tpu.pipeline_mode<synchronous>, transform_indices = @transform_4, window_bounds = array<i64: 1, 64>}, {pipeline_mode = #tpu.pipeline_mode<synchronous>, transform_indices = @transform_5, window_bounds = array<i64: 64, 64>}, {pipeline_mode = #tpu.pipeline_mode<synchronous>, transform_indices = @transform_6, window_bounds = array<i64: 1, 64>}, {pipeline_mode = #tpu.pipeline_mode<synchronous>, transform_indices = @transform_7, window_bounds = array<i64: 32, 8>}, {pipeline_mode = #tpu.pipeline_mode<synchronous>, transform_indices = @transform_8, window_bounds = array<i64: 1, 8>}, {pipeline_mode = #tpu.pipeline_mode<synchronous>, transform_indices = @transform_9, window_bounds = array<i64: 1, 32>}, {pipeline_mode = #tpu.pipeline_mode<synchronous>, transform_indices = @transform_10, window_bounds = array<i64: 1, 1>}, {transform_indices = @transform_11, window_bounds = array<i64: 2, 8>}]} {
    %c0 = arith.constant 0 : index
    %c0_0 = arith.constant 0 : index
    %0 = vector.load %arg1[%c0, %c0_0] : memref<2x16xf32, #tpu.memory_space<vmem>>, vector<2x16xf32>
    %1 = arith.truncf %0 : vector<2x16xf32> to vector<2x16xbf16>
    %c0_1 = arith.constant 0 : index
    %c0_2 = arith.constant 0 : index
    %2 = vector.load %arg2[%c0_1, %c0_2] : memref<16x32xbf16, #tpu.memory_space<vmem>>, vector<16x32xbf16>
    %cst = arith.constant dense<0.000000e+00> : vector<2x32xf32>
    %3 = tpu.matmul %1, %2, %cst {dimension_numbers = #tpu.dot_dimension_numbers<[1], [0], [0], [1], [0, 0, 1, 1], [], []>} : vector<2x16xbf16>, vector<16x32xbf16>, vector<2x32xf32> -> vector<2x32xf32>
    %c0_3 = arith.constant 0 : index
    %c0_4 = arith.constant 0 : index
    %4 = vector.load %arg3[%c0_3, %c0_4] : memref<1x32xf32, #tpu.memory_space<vmem>>, vector<1x32xf32>
    %5 = vector.broadcast %4 : vector<1x32xf32> to vector<2x32xf32>
    %6 = arith.addf %3, %5 : vector<2x32xf32>
    %cst_5 = arith.constant 0.000000e+00 : f32
    %7 = vector.broadcast %cst_5 : f32 to vector<2x32xf32>
    %8 = arith.maximumf %6, %7 : vector<2x32xf32>
    %9 = arith.truncf %8 : vector<2x32xf32> to vector<2x32xbf16>
    %c0_6 = arith.constant 0 : index
    %c0_7 = arith.constant 0 : index
    %10 = vector.load %arg4[%c0_6, %c0_7] : memref<32x64xbf16, #tpu.memory_space<vmem>>, vector<32x64xbf16>
    %cst_8 = arith.constant dense<0.000000e+00> : vector<2x64xf32>
    %11 = tpu.matmul %9, %10, %cst_8 {dimension_numbers = #tpu.dot_dimension_numbers<[1], [0], [0], [1], [0, 0, 1, 1], [], []>} : vector<2x32xbf16>, vector<32x64xbf16>, vector<2x64xf32> -> vector<2x64xf32>
    %c0_9 = arith.constant 0 : index
    %c0_10 = arith.constant 0 : index
    %12 = vector.load %arg5[%c0_9, %c0_10] : memref<1x64xf32, #tpu.memory_space<vmem>>, vector<1x64xf32>
    %13 = vector.broadcast %12 : vector<1x64xf32> to vector<2x64xf32>
    %14 = arith.addf %11, %13 : vector<2x64xf32>
    %cst_11 = arith.constant 0.000000e+00 : f32
    %15 = vector.broadcast %cst_11 : f32 to vector<2x64xf32>
    %16 = arith.maximumf %14, %15 : vector<2x64xf32>
    %17 = arith.truncf %16 : vector<2x64xf32> to vector<2x64xbf16>
    %c0_12 = arith.constant 0 : index
    %c0_13 = arith.constant 0 : index
    %18 = vector.load %arg6[%c0_12, %c0_13] : memref<64x64xbf16, #tpu.memory_space<vmem>>, vector<64x64xbf16>
    %cst_14 = arith.constant dense<0.000000e+00> : vector<2x64xf32>
    %19 = tpu.matmul %17, %18, %cst_14 {dimension_numbers = #tpu.dot_dimension_numbers<[1], [0], [0], [1], [0, 0, 1, 1], [], []>} : vector<2x64xbf16>, vector<64x64xbf16>, vector<2x64xf32> -> vector<2x64xf32>
    %c0_15 = arith.constant 0 : index
    %c0_16 = arith.constant 0 : index
    %20 = vector.load %arg7[%c0_15, %c0_16] : memref<1x64xf32, #tpu.memory_space<vmem>>, vector<1x64xf32>
    %21 = vector.broadcast %20 : vector<1x64xf32> to vector<2x64xf32>
    %22 = arith.addf %19, %21 : vector<2x64xf32>
    %cst_17 = arith.constant 0.000000e+00 : f32
    %23 = vector.broadcast %cst_17 : f32 to vector<2x64xf32>
    %24 = arith.maximumf %22, %23 : vector<2x64xf32>
    %25 = vector.extract_strided_slice %24 {offsets = [0, 0], sizes = [2, 32], strides = [1, 1]} : vector<2x64xf32> to vector<2x32xf32>
    %26 = arith.truncf %25 : vector<2x32xf32> to vector<2x32xbf16>
    %27 = vector.extract_strided_slice %24 {offsets = [0, 32], sizes = [2, 32], strides = [1, 1]} : vector<2x64xf32> to vector<2x32xf32>
    %c0_18 = arith.constant 0 : index
    %c0_19 = arith.constant 0 : index
    %28 = vector.load %arg8[%c0_18, %c0_19] : memref<32x8xbf16, #tpu.memory_space<vmem>>, vector<32x8xbf16>
    %cst_20 = arith.constant dense<0.000000e+00> : vector<2x8xf32>
    %29 = tpu.matmul %26, %28, %cst_20 {dimension_numbers = #tpu.dot_dimension_numbers<[1], [0], [0], [1], [0, 0, 1, 1], [], []>} : vector<2x32xbf16>, vector<32x8xbf16>, vector<2x8xf32> -> vector<2x8xf32>
    %c0_21 = arith.constant 0 : index
    %c0_22 = arith.constant 0 : index
    %30 = vector.load %arg9[%c0_21, %c0_22] : memref<1x8xf32, #tpu.memory_space<vmem>>, vector<1x8xf32>
    %31 = vector.broadcast %30 : vector<1x8xf32> to vector<2x8xf32>
    %32 = arith.addf %29, %31 : vector<2x8xf32>
    %c0_23 = arith.constant 0 : index
    %c0_24 = arith.constant 0 : index
    %33 = vector.load %arg10[%c0_23, %c0_24] : memref<1x32xf32, #tpu.memory_space<vmem>>, vector<1x32xf32>
    %34 = vector.broadcast %33 : vector<1x32xf32> to vector<2x32xf32>
    %35 = arith.mulf %27, %34 : vector<2x32xf32>
    %cst_25 = arith.constant dense<0.000000e+00> : vector<2xf32>
    %36 = vector.multi_reduction <add>, %35, %cst_25 [1] : vector<2x32xf32> to vector<2xf32>
    %37 = vector.shape_cast %36 : vector<2xf32> to vector<2x1xf32>
    %c0_26 = arith.constant 0 : index
    %c0_27 = arith.constant 0 : index
    %38 = vector.load %arg11[%c0_26, %c0_27] : memref<1x1xf32, #tpu.memory_space<vmem>>, vector<1x1xf32>
    %39 = vector.broadcast %38 : vector<1x1xf32> to vector<2x1xf32>
    %40 = arith.addf %37, %39 : vector<2x1xf32>
    %cst_28 = arith.constant dense<0.000000e+00> : vector<2xf32>
    %41 = vector.multi_reduction <add>, %32, %cst_28 [1] : vector<2x8xf32> to vector<2xf32>
    %42 = vector.shape_cast %41 : vector<2xf32> to vector<2x1xf32>
    %cst_29 = arith.constant 8.000000e+00 : f32
    %43 = vector.broadcast %cst_29 : f32 to vector<2x1xf32>
    %44 = arith.divf %42, %43 : vector<2x1xf32>
    %45 = vector.broadcast %40 : vector<2x1xf32> to vector<2x8xf32>
    %46 = arith.addf %45, %32 : vector<2x8xf32>
    %47 = vector.broadcast %44 : vector<2x1xf32> to vector<2x8xf32>
    %48 = arith.subf %46, %47 : vector<2x8xf32>
    %c0_30 = arith.constant 0 : index
    %c0_31 = arith.constant 0 : index
    %49 = vector.load %arg12[%c0_30, %c0_31] : memref<2x8xf32, #tpu.memory_space<vmem>>, vector<2x8xf32>
    tpu.vector_store %arg12[%c0_30, %c0_31], %48 {strides = array<i32>} : memref<2x8xf32, #tpu.memory_space<vmem>>, vector<2x8xf32>,
    return
  }
  func.func @transform_0(%arg0: i32) -> (i32, i32) {
    %c0_i32 = arith.constant 0 : i32
    %c0_i32_0 = arith.constant 0 : i32
    return %arg0, %c0_i32 : i32, i32
  }
  func.func @transform_1(%arg0: i32) -> (i32, i32) {
    %c0_i32 = arith.constant 0 : i32
    %c0_i32_0 = arith.constant 0 : i32
    %c0_i32_1 = arith.constant 0 : i32
    return %c0_i32, %c0_i32_0 : i32, i32
  }
  func.func @transform_2(%arg0: i32) -> (i32, i32) {
    %c0_i32 = arith.constant 0 : i32
    %c0_i32_0 = arith.constant 0 : i32
    %c0_i32_1 = arith.constant 0 : i32
    return %c0_i32, %c0_i32_0 : i32, i32
  }
  func.func @transform_3(%arg0: i32) -> (i32, i32) {
    %c0_i32 = arith.constant 0 : i32
    %c0_i32_0 = arith.constant 0 : i32
    %c0_i32_1 = arith.constant 0 : i32
    return %c0_i32, %c0_i32_0 : i32, i32
  }
  func.func @transform_4(%arg0: i32) -> (i32, i32) {
    %c0_i32 = arith.constant 0 : i32
    %c0_i32_0 = arith.constant 0 : i32
    %c0_i32_1 = arith.constant 0 : i32
    return %c0_i32, %c0_i32_0 : i32, i32
  }
  func.func @transform_5(%arg0: i32) -> (i32, i32) {
    %c0_i32 = arith.constant 0 : i32
    %c0_i32_0 = arith.constant 0 : i32
    %c0_i32_1 = arith.constant 0 : i32
    return %c0_i32, %c0_i32_0 : i32, i32
  }
  func.func @transform_6(%arg0: i32) -> (i32, i32) {
    %c0_i32 = arith.constant 0 : i32
    %c0_i32_0 = arith.constant 0 : i32
    %c0_i32_1 = arith.constant 0 : i32
    return %c0_i32, %c0_i32_0 : i32, i32
  }
  func.func @transform_7(%arg0: i32) -> (i32, i32) {
    %c0_i32 = arith.constant 0 : i32
    %c0_i32_0 = arith.constant 0 : i32
    %c0_i32_1 = arith.constant 0 : i32
    return %c0_i32, %c0_i32_0 : i32, i32
  }
  func.func @transform_8(%arg0: i32) -> (i32, i32) {
    %c0_i32 = arith.constant 0 : i32
    %c0_i32_0 = arith.constant 0 : i32
    %c0_i32_1 = arith.constant 0 : i32
    return %c0_i32, %c0_i32_0 : i32, i32
  }
  func.func @transform_9(%arg0: i32) -> (i32, i32) {
    %c0_i32 = arith.constant 0 : i32
    %c0_i32_0 = arith.constant 0 : i32
    %c0_i32_1 = arith.constant 0 : i32
    return %c0_i32, %c0_i32_0 : i32, i32
  }
  func.func @transform_10(%arg0: i32) -> (i32, i32) {
    %c0_i32 = arith.constant 0 : i32
    %c0_i32_0 = arith.constant 0 : i32
    %c0_i32_1 = arith.constant 0 : i32
    return %c0_i32, %c0_i32_0 : i32, i32
  }
  func.func @transform_11(%arg0: i32) -> (i32, i32) {
    %c0_i32 = arith.constant 0 : i32
    %c0_i32_0 = arith.constant 0 : i32
    return %arg0, %c0_i32 : i32, i32
  }
}

</mosaic_0001>

<bundles_post_ra>
// kernel: dueling_dqn_forward.1
= control target key start
LH: loop header
LB: loop body
LE: loop exit
PB: predicated region body
PF: predicated region fallthrough
CT: control target
= control target key end

     0   :  { %s673_s0 = inlined_call_operand.vmem [shape: f32[2,16], index: 0, kind: input, shape index: {}]   ;;  %s674_s1 = inlined_call_operand.hbm [shape: bf16[16,32], index: 1, kind: input, shape index: {}]   ;;  %s675_s2 = inlined_call_operand.vmem [shape: f32[1,32], index: 2, kind: input, shape index: {}]   ;;  %s676_s3 = inlined_call_operand.vmem [shape: bf16[32,64], index: 3, kind: input, shape index: {}]   ;;  %s677_s4 = inlined_call_operand.vmem [shape: f32[1,64], index: 4, kind: input, shape index: {}]   ;;  %s678_s5 = inlined_call_operand.vmem [shape: bf16[64,64], index: 5, kind: input, shape index: {}]   ;;  %s679_s6 = inlined_call_operand.vmem [shape: f32[1,64], index: 6, kind: input, shape index: {}]   ;;  %s680_s7 = inlined_call_operand.vmem [shape: bf16[32,8], index: 7, kind: input, shape index: {}]   ;;  %s681_s8 = inlined_call_operand.vmem [shape: f32[1,8], index: 8, kind: input, shape index: {}]   ;;  %s682_s9 = inlined_call_operand.vmem [shape: f32[1,32], index: 9, kind: input, shape index: {}]   ;;  %s683_s10 = inlined_call_operand.<no memory space> [shape: f32[1,1], index: 10, kind: input, shape index: {}]   ;;  %s684_s11 = inlined_call_operand.hbm [shape: f32[2,8], index: 11, kind: output, shape index: {}]  }
   0x1   :  { %v16_v0 = vstv %s683_s10 }
   0x2   :  { %17 = vst [vmem:[#allocation2] sm:$0x1] %v16_v0 }
   0x3   :  { %18 = vsyncpa [#allocation4], 0 }
   0x4   :  { %19 = vsyncpa [#allocation5], 0  ;;  %s527_s19 = smov [#allocation3]   ;;  %s479_s23 = scalar_lea.hbm %s674_s1, 128 }
   0x5   :  { %s27_s20 = sshll.u32 %s527_s19, 4  ;;  %p480_p0 = scmp.ne.s32.totalorder %s674_s1, %s479_s23  ;;  %s28_s20 = int_to_ptr.vmem [resolvable:$true] %s27_s20 }
   0x6   :  { %p483_p1 = scmp.lt.u32.totalorder %s479_s23, %s674_s1 }
   0x8   :  { %p485_p2 = pnand %p483_p1, %p480_p0 }
   0xa   :  { %488 = shalt.err (!%p485_p2)
}
   0xb   :  { %s489_s10 = scalar_lea.vmem %s28_s20, 128  ;;  %p494_p4 = scmp.lt.s32.totalorder %s28_s20, %s28_s20 }
   0xc   :  { %p490_p3 = scmp.ne.s32.totalorder %s28_s20, %s489_s10  ;;  %p495_p5 = scmp.lt.s32.totalorder %s489_s10, %s489_s10 }
   0xe   :  { %p496_p6 = por %p495_p5, %p494_p4 }
  0x10   :  { %p497_p7 = pnand %p496_p6, %p490_p3 }
  0x12   :  { %500 = shalt.err (!%p497_p7)
}
  0x13   :  { %s528_s28 = smov 64   ;;  %s529_s29 = smov 4  }
  0x14   :  { %33 = dma.hbm_to_vmem [thread:$0]  %s674_s1, 128, %s28_s20, [#allocation4], %s528_s28, %s528_s28, %s529_s29  }
  0x15   :  { %523 = dma.done.wait [#allocation4], 128  }
  0x16   :  { %524 = vsyncadd [#allocation4], 4294967168  ;;  %v530_v1 = vmov 0.0   ;;  %vm531_vm0 = vmmov 0   ;;  %v470_v2 = vld [vmem:[#allocation3] sm:$0xff]   ;;  %vm73_vm1 = vcmask 130048  }
  0x17   :  { %426 = vmatprep.subr.bf16.mxu0 %v530_v1  ;;  %428 = vmatprep.mubr.msk.bf16.mxu0 %vm531_vm0, %v530_v1  ;;  %v56_v3 = vld [vmem:[%s673_s0] sm:$0x3]  ;;  %v472_v6 = vld [vmem:[%s676_s3 + $0x8] sm:$0xff]   ;;  %vm142_vm2 = vcmask 261120   ;;  %v475_v17 = vld [vmem:[%s678_s5 + $0x10] sm:$0xff]   ;;  %s532_s27 = smov 32  }
  0x18   :  { %432 = vmatprep.subr.bf16.mxu1 %v530_v1  ;;  %436 = vmatprep.mubr.msk.bf16.mxu1 %vm531_vm0, %v530_v1  ;;  %v57_v4 = vpack.c.bf16 %v56_v3, %v56_v3  ;;  %v471_v5 = vld [vmem:[%s676_s3] sm:$0xff]   ;;  %v474_v8 = vld [vmem:[%s678_s5 + $0x8] sm:$0xff]   ;;  %v476_v18 = vld [vmem:[%s678_s5 + $0x18] sm:$0xff]   ;;  %vm227_vm3 = vcmask 523264   ;;  %s533_s13 = smov 96   ;;  %vm353_vm4 = vcmask 254976  }
  0x19   :  { %427 = vmatpush3.bf16.msra.mxu0 %v470_v2  ;;  %433 = vmatpush3.bf16.msra.mxu1 %v471_v5  ;;  %v473_v7 = vld [vmem:[%s678_s5] sm:$0xff]   ;;  %v478_v29 = vld [vmem:[%s680_s7 + $0x8] sm:$0xff]   ;;  %v534_v42 = vmov 0   ;;  %vm365_vm5 = vcmask 58368   ;;  %s535_s14 = smov [#allocation6]  }
  0x1a   :  { %440 = vmatprep.subr.bf16.mxu0 %v530_v1  ;;  %434 = vmatprep.subr.bf16.mxu1 %v530_v1  ;;  %v394_v9 = vld [vmem:[%s675_s2] ss:$0 sm:$0xff]  ;;  %s385_s1 = sshll.u32 %s535_s14, 4  ;;  %s386_s1 = int_to_ptr.vmem [resolvable:$true] %s385_s1 }
  0x1b   :  { %v411_v19 = vld [vmem:[%s682_s9] ss:$0 sm:$0xff]  ;;  %469 = vset.pattern.permute.xlu0 %v534_v42  ;;  %p506_p9 = scmp.lt.s32.totalorder %s386_s1, %s386_s1 }
  0x1c   :  { %429 = vmatmul.mubr.msk.bf16.vlgmr.msra.gmra.mrb[0].mxu0 %vm73_vm1, %v57_v4  ;;  %345 = vrot.lane.b32.xlu0 %v411_v19, %s532_s27  ;;  %v397_v20 = vld [vmem:[%s677_s4] ss:$0 sm:$0xff] }
  0x1d   :  { %448 = vmatprep.mubr.msk.bf16.mxu0 %vm531_vm0, %v530_v1  ;;  %435 = vmatpush3.bf16.msra.mxu1 %v472_v6  ;;  %v477_v28 = vld [vmem:[%s680_s7] sm:$0xff]  }
  0x1e   :  { %452 = vmatprep.subr.bf16.mxu1 %v530_v1  ;;  %441 = vmatpush3.bf16.msra.mxu0 %v473_v7  ;;  %v401_v30 = vld [vmem:[%s679_s6] ss:$0 sm:$0xff] }
  0x1f   :  { %442 = vmatprep.subr.bf16.mxu0 %v530_v1  ;;  %v407_v43 = vld [vmem:[%s681_s8] ss:$0 sm:$0xff]  ;;  %s501_s8 = scalar_lea.vmem %s386_s1, 32 }
  0x20   :  { %v412_v50 = vld [vmem:[#allocation2] ss:$0 sm:$0xff]  ;;  %p502_p8 = scmp.ne.s32.totalorder %s386_s1, %s501_s8  ;;  %p507_p10 = scmp.lt.s32.totalorder %s501_s8, %s501_s8 }
  0x22   :  { %443 = vmatpush3.bf16.msra.mxu0 %v474_v8  ;;  %p508_p11 = por %p507_p10, %p506_p9 }
  0x23   :  { %444 = vmatprep.subr.bf16.mxu0 %v530_v1 }
  0x24   :  { %p509_p12 = pnand %p508_p11, %p502_p8 }
  0x26   :  { %445 = vmatpush3.bf16.msra.mxu0 %v475_v17 }
  0x27   :  { %446 = vmatprep.subr.bf16.mxu0 %v530_v1 }
  0x2a   :  { %447 = vmatpush3.bf16.msra.mxu0 %v476_v18 }
  0x8e   :  { %v346_v35 = vpop.permute.xlu0 %345 }
  0xef   :  { %v111_v10 = vpop.f32.mrb[0].mxu0 }
  0xf0   :  { %v112_v11 = vadd.f32 %v394_v9, %v111_v10  ;;  %v430_v12 = vpop.f32.mrb[1].mxu0 }
  0xf1   :  { %v114_v13 = vpop.f32.mrb[2].mxu0 }
  0xf2   :  { %v117_v14 = vmax.f32 %v112_v11, 0.0  ;;  %v431_v15 = vpop.f32.mrb[3].mxu0 }
  0xf4   :  { %v118_v16 = vpack.c.bf16 %v117_v14, %v117_v14 }
  0xf6   :  { %437 = vmatmul.mubr.msk.bf16.vlgmr.msra.gmra.mrb[0].mxu1 %vm142_vm2, %v118_v16 }
  0xf7   :  { %456 = vmatprep.mubr.msk.bf16.mxu1 %vm531_vm0, %v530_v1  ;;  %453 = vmatpush3.bf16.msra.mxu1 %v477_v28 }
  0xf8   :  { %454 = vmatprep.subr.bf16.mxu1 %v530_v1 }
  0xfb   :  { %455 = vmatpush3.bf16.msra.mxu1 %v478_v29 }
 0x1c9   :  { %v180_v21 = vpop.f32.mrb[0].mxu1 }
 0x1ca   :  { %v181_v22 = vadd.f32 %v397_v20, %v180_v21  ;;  %v438_v23 = vpop.f32.mrb[1].mxu1 }
 0x1cb   :  { %v183_v24 = vpop.f32.mrb[2].mxu1 }
 0x1cc   :  { %v186_v25 = vmax.f32 %v181_v22, 0.0  ;;  %v439_v26 = vpop.f32.mrb[3].mxu1 }
 0x1ce   :  { %v187_v27 = vpack.c.bf16 %v186_v25, %v186_v25 }
 0x1d0   :  { %449 = vmatmul.mubr.msk.bf16.vlgmr.msra.gmra.mrb[4].mxu0 %vm227_vm3, %v187_v27 }
 0x2a3   :  { %v265_v31 = vpop.f32.mrb[4].mxu0 }
 0x2a4   :  { %v266_v32 = vadd.f32 %v401_v30, %v265_v31  ;;  %v450_v33 = vpop.f32.mrb[5].mxu0 }
 0x2a5   :  { %v268_v34 = vpop.f32.mrb[6].mxu0 }
 0x2a6   :  { %v271_v36 = vmax.f32 %v266_v32, 0.0  ;;  %v451_v37 = vpop.f32.mrb[7].mxu0 }
 0x2a8   :  { %v272_v38 = vpack.c.bf16 %v271_v36, %v271_v36  ;;  %v348_v39 = vmul.f32 %v346_v35, %v271_v36 }
 0x2aa   :  { %350 = vrot.lane.b32.xlu0 %v348_v39, %s533_s13  ;;  %457 = vmatmul.mubr.msk.bf16.vlgmr.msra.gmra.mrb[4].mxu1 %vm142_vm2, %v272_v38 }
 0x31c   :  { %v351_v40 = vpop.permute.xlu0 %350 }
 0x31d   :  { %v354_v41 = vsel %vm353_vm4, %v351_v40, 0.0 }
 0x31e   :  { %355 = vadd.xlane.f32.xlu1 %v354_v41 }
 0x37d   :  { %v333_v44 = vpop.f32.mrb[4].mxu1 }
 0x37e   :  { %v334_v45 = vadd.f32 %v407_v43, %v333_v44  ;;  %v458_v46 = vpop.f32.mrb[5].mxu1 }
 0x37f   :  { %v336_v47 = vpop.f32.mrb[6].mxu1 }
 0x380   :  { %v459_v48 = vpop.f32.mrb[7].mxu1  ;;  %v366_v49 = vsel %vm365_vm5, %v334_v45, 0.0 }
 0x381   :  { %367 = vadd.xlane.f32.xlu1 %v366_v49 }
 0x3ab   :  { %v356_v51 = vpop.xlane.xlu1 %355 }
 0x3ac   :  { %v364_v52 = vadd.f32 %v412_v50, %v356_v51 }
 0x3ae   :  { %373 = vperm.xlu0 %469, %v364_v52  }
 0x40e   :  { %v368_v53 = vpop.xlane.xlu1 %367 }
 0x40f   :  { %v370_v55 = vmul.f32 0.125, %v368_v53 }
 0x42d   :  { %v374_v54 = vpop.permute.xlu0 %373 }
 0x42e   :  { %v376_v56 = vadd.f32 %v374_v54, %v334_v45 }
 0x430   :  { %v377_v57 = vsub.f32 %v376_v56, %v370_v55 }
 0x432   :  { %378 = vst.msk [vmem:[#allocation6] sm:$0x3] %vm365_vm5, %v377_v57 }
 0x433   :  { %512 = shalt.err (!%p509_p12)
}
 0x434   :  { %s513_s17 = scalar_lea.hbm %s684_s11, 32 }
 0x435   :  { %p514_p13 = scmp.ne.s32.totalorder %s684_s11, %s513_s17  ;;  %p517_p0 = scmp.lt.u32.totalorder %s513_s17, %s684_s11 }
 0x437   :  { %p519_p1 = pnand %p517_p0, %p514_p13 }
 0x439   :  { %522 = shalt.err (!%p519_p1)
}
 0x43a   :  { %388 = dma.vmem_to_hbm [thread:$0]  %s386_s1, 32, %s684_s11, [#allocation5]  }
 0x43b   :  { %525 = dma.done.wait [#allocation5], 32  }
 0x43c   :  { %526 = vsyncadd [#allocation5], 4294967264 }
 0x43d   :  { %392 = vsyncpa [#allocation4], 1 }
 0x43e   :  { %393 = vsyncpa [#allocation5], 1 }

</bundles_post_ra>
